<compile_context>
chip_gen: v7x
topology: tpu7x:2x2x1
jax: 0.10.0
libtpu: 0.0.40
codegen_flags: <defaults>
</compile_context>

<pallas_src>
import functools

import jax
import jax.numpy as jnp
from jax.experimental import pallas as pl
from jax.experimental.pallas import tpu as pltpu

IN_F = 120    # fc2 in_features
HID_F = 84    # fc2 out_features / fc3 in_features
OUT_F = 10    # fc3 out_features
LANE = 128    # TPU lane width


def _round_up(n, m):
    return (n + m - 1) // m * m


def _pick_tm(batch):
    """Batch tile for an HBM-streaming kernel.

    Big tiles amortize the ~0.35us fixed per-grid-step overhead; but keep at
    least 2 grid steps (4 for large batches) so both v7x TensorCores get work
    and the next tile's DMA overlaps the current tile's compute.
    """
    if batch <= 256:
        return batch                              # single full-extent tile (always legal)
    if batch >= 2048:
        tm = _round_up(pl.cdiv(batch, 4), 16)     # >= 4 steps
    else:
        tm = _round_up(pl.cdiv(batch, 2), 16)     # >= 2 steps
    return max(16, min(tm, 2048))


def _net_kernel(x_ref, w2_ref, b2_ref, w3_ref, b3_ref, o_ref):
    # One (TM, 120) batch tile per grid step.  Weights/biases are VMEM-resident
    # (constant index_map).  Two MXU matmuls with f32 accumulation, VPU
    # bias/relu/add in f32.  Padded weight lanes are exact zeros, so h's lanes
    # 84..127 stay zero through bias/relu/add.
    x = x_ref[...].astype(w2_ref.dtype)                                # (TM, 120), cast in VMEM
    h = jnp.dot(x, w2_ref[...], preferred_element_type=jnp.float32)    # (TM, 128) f32
    h = h + b2_ref[...]                                                # fc2 bias
    h = h + jnp.maximum(h, 0.0)                                        # x + relu(x)
    y = jnp.dot(h.astype(w3_ref.dtype), w3_ref[...],
                preferred_element_type=jnp.float32)                    # (TM, 128) f32
    y = y + b3_ref[...]                                                # fc3 bias
    o_ref[...] = y[:, :OUT_F].astype(o_ref.dtype)                      # narrow (TM, 10) store


@functools.partial(jax.jit, static_argnames=("compute_dtype", "tm"))
def net_forward(x, w2, b2, w3, b3, *, compute_dtype=jnp.bfloat16, tm=None):
    """Forward pass of Net.

    x : (B, 120)   input (any float dtype; streamed as-is, cast in-kernel)
    w2: (120, 84)  fc2 weight, stored (in, out) i.e. transposed vs torch
    b2: (84,) or (1, 84)   fc2 bias
    w3: (84, 10)   fc3 weight, stored (in, out)
    b3: (10,) or (1, 10)   fc3 bias
    returns (B, 10) float32
    """
    B, in_f = x.shape
    assert in_f == IN_F
    if tm is None:
        tm = _pick_tm(B)

    cdt = jnp.dtype(compute_dtype)

    # Weights are tiny (~100 KB padded): pad/cast them once per call (negligible
    # vs. the x stream).  Padded lanes are exact zeros so the math is exact on
    # the real 84 / 10 output lanes.
    w2_p = jnp.zeros((IN_F, LANE), cdt).at[:, :HID_F].set(w2.astype(cdt))
    w3_p = jnp.zeros((LANE, LANE), cdt).at[:HID_F, :OUT_F].set(w3.astype(cdt))
    b2_p = jnp.zeros((1, LANE), jnp.float32).at[:, :HID_F].set(
        b2.reshape(1, HID_F).astype(jnp.float32))
    b3_p = jnp.zeros((1, LANE), jnp.float32).at[:, :OUT_F].set(
        b3.reshape(1, OUT_F).astype(jnp.float32))

    grid = (pl.cdiv(B, tm),)

    # Advisory estimate for XLA scheduling, consistent with the real traffic:
    # unpadded x read, small weights, narrow (B,10) f32 output.
    cost = pl.CostEstimate(
        flops=2 * B * (IN_F * HID_F + HID_F * OUT_F),
        transcendentals=0,
        bytes_accessed=(x.size * x.dtype.itemsize
                        + (w2_p.size + w3_p.size) * cdt.itemsize
                        + (b2_p.size + b3_p.size) * 4
                        + B * OUT_F * 4),
    )

    out = pl.pallas_call(
        _net_kernel,
        out_shape=jax.ShapeDtypeStruct((B, OUT_F), jnp.float32),
        grid=grid,
        in_specs=[
            pl.BlockSpec((tm, IN_F), lambda i: (i, 0)),      # x: batch-tiled, unpadded
            pl.BlockSpec((IN_F, LANE), lambda i: (0, 0)),    # w2: VMEM-resident
            pl.BlockSpec((1, LANE), lambda i: (0, 0)),       # b2
            pl.BlockSpec((LANE, LANE), lambda i: (0, 0)),    # w3
            pl.BlockSpec((1, LANE), lambda i: (0, 0)),       # b3
        ],
        out_specs=pl.BlockSpec((tm, OUT_F), lambda i: (i, 0)),  # narrow (B,10) output
        compiler_params=pltpu.CompilerParams(
            dimension_semantics=("parallel",),   # batch tiles are independent (v7x 2-TC)
            vmem_limit_bytes=32 * 1024 * 1024,   # far above need; safe on v7x's 64 MiB
        ),
        cost_estimate=cost,
    )(x, w2_p, b2_p, w3_p, b3_p)

    return out


def init_params(key):
    """Deterministic init mimicking PyTorch nn.Linear default (uniform +/- 1/sqrt(fan_in))."""
    k1, k2, k3, k4 = jax.random.split(key, 4)
    bound2 = 1.0 / jnp.sqrt(120.0)
    bound3 = 1.0 / jnp.sqrt(84.0)
    # Stored as (in, out), i.e. already transposed relative to torch's (out, in).
    w2 = jax.random.uniform(k1, (120, 84), jnp.float32, -bound2, bound2)
    b2 = jax.random.uniform(k2, (1, 84), jnp.float32, -bound2, bound2)
    w3 = jax.random.uniform(k3, (84, 10), jnp.float32, -bound3, bound3)
    b3 = jax.random.uniform(k4, (1, 10), jnp.float32, -bound3, bound3)
    return w2, b2, w3, b3


def reference_forward(x, w2, b2, w3, b3):
    h = x @ w2 + b2
    h = h + jnp.maximum(h, 0.0)
    return h @ w3 + b3


if __name__ == "__main__":
    key = jax.random.PRNGKey(0)
    kx1, kx2, kp = jax.random.split(key, 3)
    w2, b2, w3, b3 = init_params(kp)

    # --- small batch: single full-extent tile ---
    B_small = 16
    x_small = jax.random.normal(kx1, (B_small, IN_F), jnp.float32)
    out_small = jax.block_until_ready(
        net_forward(x_small, w2, b2, w3, b3, compute_dtype=jnp.float32))
    ref_small = reference_forward(x_small, w2, b2, w3, b3)
    assert out_small.shape == (B_small, OUT_F), out_small.shape
    assert jnp.allclose(out_small, ref_small, atol=1e-4, rtol=1e-4), "f32 small-batch mismatch"

    # --- larger odd-sized batch: 2-step grid with a masked ragged tail ---
    B_big = 500
    x_big = jax.random.normal(kx2, (B_big, IN_F), jnp.float32)
    out_f32 = jax.block_until_ready(
        net_forward(x_big, w2, b2, w3, b3, compute_dtype=jnp.float32))
    ref_big = reference_forward(x_big, w2, b2, w3, b3)
    assert out_f32.shape == (B_big, OUT_F), out_f32.shape
    assert jnp.allclose(out_f32, ref_big, atol=1e-4, rtol=1e-4), "f32 big-batch mismatch"

    # --- default path: bf16 weights / matmul inputs, f32 accumulation ---
    out_bf16 = jax.block_until_ready(net_forward(x_big, w2, b2, w3, b3))
    assert out_bf16.shape == (B_big, OUT_F), out_bf16.shape
    assert jnp.allclose(out_bf16, ref_big, atol=0.15, rtol=0.15), "bf16-weight path diverged"

    # --- bf16 activations too (the case where the halved x read stream pays off) ---
    out_bf16x = jax.block_until_ready(
        net_forward(x_big.astype(jnp.bfloat16), w2, b2, w3, b3))
    assert out_bf16x.shape == (B_big, OUT_F), out_bf16x.shape
    assert bool(jnp.all(jnp.isfinite(out_bf16x))), "bf16 activation path non-finite"
    assert jnp.allclose(out_bf16x, ref_big, atol=0.2, rtol=0.2), "bf16 activation path diverged"

    print("KERNEL_OK")
</pallas_src>

<mosaic_0001>
module attributes {stable_mosaic.version = 11 : i64} {
  func.func @_net_kernel(%arg0: i32, %arg1: memref<16x120xf32, #tpu.memory_space<vmem>>, %arg2: memref<120x128xf32, #tpu.memory_space<vmem>>, %arg3: memref<1x128xf32, #tpu.memory_space<vmem>>, %arg4: memref<128x128xf32, #tpu.memory_space<vmem>>, %arg5: memref<1x128xf32, #tpu.memory_space<vmem>>, %arg6: memref<16x10xf32, #tpu.memory_space<vmem>>) attributes {dimension_semantics = [#tpu.dimension_semantics<parallel>], iteration_bounds = array<i64: 1>, scalar_prefetch = 0 : i64, scratch_operands = 0 : i64, tpu.core_type = #tpu.core_type<tc>, window_params = [{transform_indices = @transform_0, window_bounds = array<i64: 16, 120>}, {pipeline_mode = #tpu.pipeline_mode<synchronous>, transform_indices = @transform_1, window_bounds = array<i64: 120, 128>}, {pipeline_mode = #tpu.pipeline_mode<synchronous>, transform_indices = @transform_2, window_bounds = array<i64: 1, 128>}, {pipeline_mode = #tpu.pipeline_mode<synchronous>, transform_indices = @transform_3, window_bounds = array<i64: 128, 128>}, {pipeline_mode = #tpu.pipeline_mode<synchronous>, transform_indices = @transform_4, window_bounds = array<i64: 1, 128>}, {transform_indices = @transform_5, window_bounds = array<i64: 16, 10>}]} {
    %c0 = arith.constant 0 : index
    %c0_0 = arith.constant 0 : index
    %0 = vector.load %arg1[%c0, %c0_0] : memref<16x120xf32, #tpu.memory_space<vmem>>, vector<16x120xf32>
    %c0_1 = arith.constant 0 : index
    %c0_2 = arith.constant 0 : index
    %1 = vector.load %arg2[%c0_1, %c0_2] : memref<120x128xf32, #tpu.memory_space<vmem>>, vector<120x128xf32>
    %cst = arith.constant dense<0.000000e+00> : vector<16x128xf32>
    %2 = tpu.matmul %0, %1, %cst {dimension_numbers = #tpu.dot_dimension_numbers<[1], [0], [0], [1], [0, 0, 1, 1], [], []>} : vector<16x120xf32>, vector<120x128xf32>, vector<16x128xf32> -> vector<16x128xf32>
    %c0_3 = arith.constant 0 : index
    %c0_4 = arith.constant 0 : index
    %3 = vector.load %arg3[%c0_3, %c0_4] : memref<1x128xf32, #tpu.memory_space<vmem>>, vector<1x128xf32>
    %4 = vector.broadcast %3 : vector<1x128xf32> to vector<16x128xf32>
    %5 = arith.addf %2, %4 : vector<16x128xf32>
    %cst_5 = arith.constant 0.000000e+00 : f32
    %6 = vector.broadcast %cst_5 : f32 to vector<16x128xf32>
    %7 = arith.maximumf %5, %6 : vector<16x128xf32>
    %8 = arith.addf %5, %7 : vector<16x128xf32>
    %c0_6 = arith.constant 0 : index
    %c0_7 = arith.constant 0 : index
    %9 = vector.load %arg4[%c0_6, %c0_7] : memref<128x128xf32, #tpu.memory_space<vmem>>, vector<128x128xf32>
    %cst_8 = arith.constant dense<0.000000e+00> : vector<16x128xf32>
    %10 = tpu.matmul %8, %9, %cst_8 {dimension_numbers = #tpu.dot_dimension_numbers<[1], [0], [0], [1], [0, 0, 1, 1], [], []>} : vector<16x128xf32>, vector<128x128xf32>, vector<16x128xf32> -> vector<16x128xf32>
    %c0_9 = arith.constant 0 : index
    %c0_10 = arith.constant 0 : index
    %11 = vector.load %arg5[%c0_9, %c0_10] : memref<1x128xf32, #tpu.memory_space<vmem>>, vector<1x128xf32>
    %12 = vector.broadcast %11 : vector<1x128xf32> to vector<16x128xf32>
    %13 = arith.addf %10, %12 : vector<16x128xf32>
    %14 = vector.extract_strided_slice %13 {offsets = [0, 0], sizes = [16, 10], strides = [1, 1]} : vector<16x128xf32> to vector<16x10xf32>
    %c0_11 = arith.constant 0 : index
    %c0_12 = arith.constant 0 : index
    %15 = vector.load %arg6[%c0_11, %c0_12] : memref<16x10xf32, #tpu.memory_space<vmem>>, vector<16x10xf32>
    tpu.vector_store %arg6[%c0_11, %c0_12], %14 {strides = array<i32>} : memref<16x10xf32, #tpu.memory_space<vmem>>, vector<16x10xf32>,
    return
  }
  func.func @transform_0(%arg0: i32) -> (i32, i32) {
    %c0_i32 = arith.constant 0 : i32
    %c0_i32_0 = arith.constant 0 : i32
    return %arg0, %c0_i32 : i32, i32
  }
  func.func @transform_1(%arg0: i32) -> (i32, i32) {
    %c0_i32 = arith.constant 0 : i32
    %c0_i32_0 = arith.constant 0 : i32
    %c0_i32_1 = arith.constant 0 : i32
    return %c0_i32, %c0_i32_0 : i32, i32
  }
  func.func @transform_2(%arg0: i32) -> (i32, i32) {
    %c0_i32 = arith.constant 0 : i32
    %c0_i32_0 = arith.constant 0 : i32
    %c0_i32_1 = arith.constant 0 : i32
    return %c0_i32, %c0_i32_0 : i32, i32
  }
  func.func @transform_3(%arg0: i32) -> (i32, i32) {
    %c0_i32 = arith.constant 0 : i32
    %c0_i32_0 = arith.constant 0 : i32
    %c0_i32_1 = arith.constant 0 : i32
    return %c0_i32, %c0_i32_0 : i32, i32
  }
  func.func @transform_4(%arg0: i32) -> (i32, i32) {
    %c0_i32 = arith.constant 0 : i32
    %c0_i32_0 = arith.constant 0 : i32
    %c0_i32_1 = arith.constant 0 : i32
    return %c0_i32, %c0_i32_0 : i32, i32
  }
  func.func @transform_5(%arg0: i32) -> (i32, i32) {
    %c0_i32 = arith.constant 0 : i32
    %c0_i32_0 = arith.constant 0 : i32
    return %arg0, %c0_i32 : i32, i32
  }
}

</mosaic_0001>

<bundles_post_ra>
// kernel: net_forward.1
= control target key start
LH: loop header
LB: loop body
LE: loop exit
PB: predicated region body
PF: predicated region fallthrough
CT: control target
= control target key end

     0   :  { %vm45_vm0 = vcmask 982016   ;;  %s594_s0 = inlined_call_operand.vmem [shape: f32[16,120], index: 0, kind: input, shape index: {}]   ;;  %s595_s1 = inlined_call_operand.vmem [shape: f32[120,128], index: 1, kind: input, shape index: {}]   ;;  %s596_s2 = inlined_call_operand.vmem [shape: f32[1,128], index: 2, kind: input, shape index: {}]   ;;  %s597_s3 = inlined_call_operand.vmem [shape: f32[128,128], index: 3, kind: input, shape index: {}]   ;;  %s598_s4 = inlined_call_operand.vmem [shape: f32[1,128], index: 4, kind: input, shape index: {}]   ;;  %s599_s5 = inlined_call_operand.hbm [shape: f32[16,10], index: 5, kind: output, shape index: {}]  }
   0x1   :  { %v23_v0 = vld [vmem:[%s595_s1] sm:$0xff]  ;;  %v24_v1 = vld [vmem:[%s595_s1 + $0x8] sm:$0xff]  ;;  %v25_v2 = vld [vmem:[%s595_s1 + $0x10] sm:$0xff] }
   0x2   :  { %v355_v3 = vpack.c.bf16 %v24_v1, %v23_v0  ;;  %v26_v4 = vld [vmem:[%s595_s1 + $0x18] sm:$0xff]  ;;  %v27_v6 = vld [vmem:[%s595_s1 + $0x20] sm:$0xff]  ;;  %v28_v7 = vld [vmem:[%s595_s1 + $0x28] sm:$0xff] }
   0x3   :  { %v359_v5 = vpack.c.bf16 %v26_v4, %v25_v2  ;;  %v29_v8 = vld [vmem:[%s595_s1 + $0x30] sm:$0xff]  ;;  %v363_v9 = vpack.c.bf16 %v28_v7, %v27_v6  ;;  %v30_v10 = vld [vmem:[%s595_s1 + $0x38] sm:$0xff]  ;;  %v21_v11 = vld [vmem:[%s594_s0] sm:$0xff] }
   0x4   :  { %356 = vmatprep.subr.bf16.mxu0 %v355_v3  ;;  %v131_v12 = vld [vmem:[%s597_s3] sm:$0xff]  ;;  %317 = vmatprep.mubr.msk.f32.mxu0 %vm45_vm0, %v21_v11  ;;  %v132_v13 = vld [vmem:[%s597_s3 + $0x8] sm:$0xff]  ;;  %v133_v14 = vld [vmem:[%s597_s3 + $0x10] sm:$0xff]  ;;  %v367_v20 = vpack.c.bf16 %v30_v10, %v29_v8 }
   0x5   :  { %358 = vmatpush3.bf16.msra.mxu0 %v355_v3  ;;  %v134_v15 = vld [vmem:[%s597_s3 + $0x18] sm:$0xff]  ;;  %v383_v16 = vpack.c.bf16 %v132_v13, %v131_v12  ;;  %v135_v18 = vld [vmem:[%s597_s3 + $0x20] sm:$0xff]  ;;  %v136_v19 = vld [vmem:[%s597_s3 + $0x28] sm:$0xff] }
   0x6   :  { %360 = vmatprep.subr.bf16.mxu0 %v359_v5  ;;  %v387_v17 = vpack.c.bf16 %v134_v15, %v133_v14 }
   0x7   :  { %384 = vmatprep.subr.bf16.mxu1 %v383_v16 }
   0x9   :  { %362 = vmatpush3.bf16.msra.mxu0 %v359_v5 }
   0xa   :  { %364 = vmatprep.subr.bf16.mxu0 %v363_v9 }
   0xb   :  { %10 = vsyncpa [#allocation3], 0  ;;  %v31_v21 = vld [vmem:[%s595_s1 + $0x40] sm:$0xff]  ;;  %v32_v22 = vld [vmem:[%s595_s1 + $0x48] sm:$0xff]  ;;  %386 = vmatpush3.bf16.msra.mxu1 %v383_v16  ;;  %v391_v23 = vpack.c.bf16 %v136_v19, %v135_v18  ;;  %vm229_vm1 = vcmask 80896  }
   0xc   :  { %388 = vmatprep.subr.bf16.mxu1 %v387_v17  ;;  %v137_v24 = vld [vmem:[%s597_s3 + $0x30] sm:$0xff]  ;;  %v138_v25 = vld [vmem:[%s597_s3 + $0x38] sm:$0xff]  ;;  %v371_v26 = vpack.c.bf16 %v32_v22, %v31_v21  ;;  %v139_v30 = vld [vmem:[%s597_s3 + $0x40] sm:$0xff] }
   0xd   :  { %366 = vmatpush3.bf16.msra.mxu0 %v363_v9  ;;  %v33_v27 = vld [vmem:[%s595_s1 + $0x50] sm:$0xff]  ;;  %v34_v28 = vld [vmem:[%s595_s1 + $0x58] sm:$0xff]  ;;  %v395_v29 = vpack.c.bf16 %v138_v25, %v137_v24  ;;  %v140_v31 = vld [vmem:[%s597_s3 + $0x48] sm:$0xff] }
   0xe   :  { %368 = vmatprep.subr.bf16.mxu0 %v367_v20  ;;  %v375_v32 = vpack.c.bf16 %v34_v28, %v33_v27  ;;  %v35_v33 = vld [vmem:[%s595_s1 + $0x60] sm:$0xff]  ;;  %v36_v34 = vld [vmem:[%s595_s1 + $0x68] sm:$0xff]  ;;  %v399_v35 = vpack.c.bf16 %v140_v31, %v139_v30  ;;  %v141_v36 = vld [vmem:[%s597_s3 + $0x50] sm:$0xff] }
   0xf   :  { %390 = vmatpush3.bf16.msra.mxu1 %v387_v17  ;;  %v142_v37 = vld [vmem:[%s597_s3 + $0x58] sm:$0xff]  ;;  %v379_v38 = vpack.c.bf16 %v36_v34, %v35_v33  ;;  %v37_v40 = vld [vmem:[%s595_s1 + $0x70] sm:$0xff]  ;;  %v22_v41 = vld [vmem:[%s594_s0 + $0x8] sm:$0xff] }
  0x10   :  { %392 = vmatprep.subr.bf16.mxu1 %v391_v23  ;;  %v403_v39 = vpack.c.bf16 %v142_v37, %v141_v36  ;;  %v143_v42 = vld [vmem:[%s597_s3 + $0x60] sm:$0xff]  ;;  %v144_v43 = vld [vmem:[%s597_s3 + $0x68] sm:$0xff]  ;;  %v145_v45 = vld [vmem:[%s597_s3 + $0x70] sm:$0xff] }
  0x11   :  { %370 = vmatpush3.bf16.msra.mxu0 %v367_v20  ;;  %v407_v44 = vpack.c.bf16 %v144_v43, %v143_v42  ;;  %v146_v46 = vld [vmem:[%s597_s3 + $0x78] sm:$0xff]  ;;  %v248_v48 = vld [vmem:[%s596_s2] ss:$0 sm:$0xff]  ;;  %s442_s3 = smov [#allocation2]  }
  0x12   :  { %372 = vmatprep.subr.bf16.mxu0 %v371_v26  ;;  %v411_v47 = vpack.c.bf16 %v146_v46, %v145_v45  ;;  %v251_v57 = vld [vmem:[%s598_s4] ss:$0 sm:$0xff]  ;;  %s237_s11 = sshll.u32 %s442_s3, 4  ;;  %s238_s11 = int_to_ptr.vmem [resolvable:$true] %s237_s11 }
  0x13   :  { %394 = vmatpush3.bf16.msra.mxu1 %v391_v23  ;;  %s418_s2 = scalar_lea.vmem %s238_s11, 256  ;;  %p423_p1 = scmp.lt.s32.totalorder %s238_s11, %s238_s11 }
  0x14   :  { %396 = vmatprep.subr.bf16.mxu1 %v395_v29  ;;  %p419_p0 = scmp.ne.s32.totalorder %s238_s11, %s418_s2  ;;  %p424_p2 = scmp.lt.s32.totalorder %s418_s2, %s418_s2 }
  0x15   :  { %374 = vmatpush3.bf16.msra.mxu0 %v371_v26 }
  0x16   :  { %376 = vmatprep.subr.bf16.mxu0 %v375_v32  ;;  %p425_p3 = por %p424_p2, %p423_p1 }
  0x17   :  { %398 = vmatpush3.bf16.msra.mxu1 %v395_v29 }
  0x18   :  { %400 = vmatprep.subr.bf16.mxu1 %v399_v35  ;;  %p426_p4 = pnand %p425_p3, %p419_p0 }
  0x19   :  { %378 = vmatpush3.bf16.msra.mxu0 %v375_v32 }
  0x1a   :  { %380 = vmatprep.subr.bf16.mxu0 %v379_v38 }
  0x1b   :  { %402 = vmatpush3.bf16.msra.mxu1 %v399_v35 }
  0x1c   :  { %404 = vmatprep.subr.bf16.mxu1 %v403_v39 }
  0x1d   :  { %382 = vmatpush3.bf16.msra.mxu0 %v379_v38 }
  0x1e   :  { %315 = vmatprep.subr.mxu0 %v37_v40 }
  0x1f   :  { %406 = vmatpush3.bf16.msra.mxu1 %v403_v39 }
  0x20   :  { %408 = vmatprep.subr.bf16.mxu1 %v407_v44 }
  0x21   :  { %316 = vmatpush3.msra.mxu0 %v37_v40 }
  0x22   :  { %318 = vmatmul.mubr.msk.f32.vlgmr.msra.gmra.mrb[0].mxu0 %vm45_vm0, %v22_v41 }
  0x23   :  { %410 = vmatpush3.bf16.msra.mxu1 %v407_v44 }
  0x24   :  { %412 = vmatprep.subr.bf16.mxu1 %v411_v47 }
  0x27   :  { %414 = vmatpush3.bf16.msra.mxu1 %v411_v47 }
  0xf5   :  { %v319_v49 = vpop.f32.mrb[0].mxu0 }
  0xf6   :  { %v124_v50 = vadd.f32 %v319_v49, %v248_v48  ;;  %v118_v51 = vpop.f32.mrb[1].mxu0 }
  0xf7   :  { %v119_v52 = vadd.f32 %v248_v48, %v118_v51 }
  0xf8   :  { %v128_v53 = vmax.f32 %v124_v50, 0.0 }
  0xf9   :  { %v127_v54 = vmax.f32 %v119_v52, 0.0 }
  0xfa   :  { %v130_v56 = vadd.f32 %v128_v53, %v124_v50 }
  0xfb   :  { %v129_v55 = vadd.f32 %v127_v54, %v119_v52 }
  0xfd   :  { %352 = vmatprep.mubr.f32.mxu1 %v129_v55 }
  0xfe   :  { %353 = vmatmul.mubr.f32.vlgmr.msra.gmra.mrb[0].mxu1 %v130_v56 }
 0x1d1   :  { %v354_v58 = vpop.f32.mrb[0].mxu1 }
 0x1d2   :  { %v226_v59 = vadd.f32 %v354_v58, %v251_v57  ;;  %v220_v60 = vpop.f32.mrb[1].mxu1 }
 0x1d3   :  { %v221_v61 = vadd.f32 %v251_v57, %v220_v60 }
 0x1d4   :  { %231 = vst.msk [vmem:[#allocation2 + $0x8] sm:$0xff] %vm229_vm1, %v226_v59 }
 0x1d5   :  { %230 = vst.msk [vmem:[#allocation2] sm:$0xff] %vm229_vm1, %v221_v61 }
 0x1d6   :  { %429 = shalt.err (!%p426_p4)
}
 0x1d7   :  { %s430_s4 = scalar_lea.hbm %s599_s5, 256 }
 0x1d8   :  { %p431_p5 = scmp.ne.s32.totalorder %s599_s5, %s430_s4  ;;  %p434_p6 = scmp.lt.u32.totalorder %s430_s4, %s599_s5 }
 0x1da   :  { %p436_p7 = pnand %p434_p6, %p431_p5 }
 0x1dc   :  { %439 = shalt.err (!%p436_p7)
}
 0x1dd   :  { %s443_s18 = smov 128   ;;  %s444_s19 = smov 8  }
 0x1de   :  { %243 = dma.vmem_to_hbm [thread:$0]  %s238_s11, 256, %s599_s5, [#allocation3], %s443_s18, %s443_s18, %s444_s19  }
 0x1df   :  { %440 = dma.done.wait [#allocation3], 256  }
 0x1e0   :  { %441 = vsyncadd [#allocation3], 4294967040 }
 0x1e1   :  { %247 = vsyncpa [#allocation3], 1 }

</bundles_post_ra>
